<compile_context>
chip_gen: v7x
topology: tpu7x:2x2x1
jax: 0.10.0
libtpu: 0.0.40
codegen_flags: <defaults>
</compile_context>

<pallas_src>
import jax
import jax.numpy as jnp
from jax.experimental import pallas as pl
from jax.experimental.pallas import tpu as pltpu


def _round_up(x: int, m: int) -> int:
    return (x + m - 1) // m * m


def _make_kernel(num_layers: int, Tc: int, Bp: int):
    """Fused kernel. Tc = T - kernel_size + 1 (conv output length), Bp = padded batch."""

    def kernel(x_tm_ref,     # ((Tc+1)*Bp, C)  time-major padded input, row = t*Bp + b
               w0p_ref,      # (C, H)  conv tap0 folded with wih[0]
               w1p_ref,      # (C, H)  conv tap1 folded with wih[0]
               b0p_ref,      # (1, H)  bconv@wih[0] + bih[0] + bhh[0]
               wihn_ref,     # (max(L-1,1), H, H)  wih[1:] (dummy, never read, if L == 1)
               whh_ref,      # (L, H, H)  used as h @ whh[l]
               brnnn_ref,    # (max(L-1,1), 1, H)  (bih+bhh)[1:] (dummy if L == 1)
               wfc_ref,      # (H, Op)  lane-padded FC weight
               bfc_ref,      # (1, Op)
               out_ref,      # (Bp, Op)
               xa_ref,       # scratch (Tc*Bp, H)  xproj buffer A
               xb_ref):      # scratch (Tc*Bp, H)  xproj buffer B
        H = whh_ref.shape[-1]

        # ---- layer-0 input projection (conv folded in), one batched store ----
        x_lo = x_tm_ref[0:Tc * Bp, :]          # x_t   rows (sublane-aligned slice)
        x_hi = x_tm_ref[Bp:(Tc + 1) * Bp, :]   # x_{t+1} rows
        xa_ref[...] = (
            jnp.dot(x_lo, w0p_ref[...], preferred_element_type=jnp.float32)
            + jnp.dot(x_hi, w1p_ref[...], preferred_element_type=jnp.float32)
            + b0p_ref[...]
        )

        # ---- stacked Elman RNN (tanh), h0 = 0, batch_first semantics ----
        bufs = (xa_ref, xb_ref)
        h = jnp.zeros((Bp, H), jnp.float32)
        for l in range(num_layers):                       # static
            cur = bufs[l % 2]                             # this layer's xproj
            nxt = bufs[(l + 1) % 2]                       # next layer's xproj
            whh = whh_ref[l]                              # (H, H)
            last_layer = (l + 1 == num_layers)
            if not last_layer:
                wih_next = wihn_ref[l]                    # (H, H)
                b_next = brnnn_ref[l]                     # (1, H)

            h = jnp.zeros((Bp, H), jnp.float32)
            for t in range(Tc):                           # static, small -> unrolled
                xp = cur[t * Bp:(t + 1) * Bp, :]          # full (8, H) sublane tile
                h = jnp.tanh(
                    xp + jnp.dot(h, whh, preferred_element_type=jnp.float32))
                if not last_layer:
                    # Next layer's input projection, interleaved under this
                    # layer's recurrence; does not feed h (off the serial chain).
                    nxt[t * Bp:(t + 1) * Bp, :] = (
                        jnp.dot(h, wih_next, preferred_element_type=jnp.float32)
                        + b_next)

        # ---- fc on the last timestep of the last layer (lane-dense store) ----
        out_ref[...] = (
            jnp.dot(h, wfc_ref[...], preferred_element_type=jnp.float32)
            + bfc_ref[...])

    return kernel


def cnn_rnn_forward(x, params):
    """x: (B, T, C_in) float32.  Returns (B, output_size) float32."""
    w0, w1, bconv, wih, whh, bih, bhh, wfc, bfc = params
    B, T, C = x.shape
    H = w0.shape[1]
    O = wfc.shape[1]
    L = wih.shape[0]
    Tc = T - 1                       # conv kernel_size = 2, no padding
    Bp = _round_up(B, 8)             # pad batch to one sublane tile
    Op = _round_up(O, 128)           # lane-dense output slab

    # Time-major input, batch padded with zero rows (sliced away at the end).
    x_tm = jnp.zeros((T, Bp, C), jnp.float32).at[:, :B, :].set(
        jnp.transpose(x, (1, 0, 2))).reshape(T * Bp, C)

    brnn = bih + bhh                                     # (L, 1, H)
    # Fold Conv1d(k=2) into layer-0's input projection.
    w0p = w0 @ wih[0]                                    # (C, H)
    w1p = w1 @ wih[0]                                    # (C, H)
    b0p = bconv @ wih[0] + brnn[0]                       # (1, H)
    # Input projections for layers 1..L-1 (dummy if single layer; never read).
    if L > 1:
        wihn = wih[1:]
        brnnn = brnn[1:]
    else:
        wihn = jnp.zeros((1, H, H), jnp.float32)
        brnnn = jnp.zeros((1, 1, H), jnp.float32)

    # Lane-padded FC weights -> unmasked full-tile output store.
    wfc_p = jnp.zeros((H, Op), jnp.float32).at[:, :O].set(wfc)
    bfc_p = jnp.zeros((1, Op), jnp.float32).at[:, :O].set(bfc)

    out = pl.pallas_call(
        _make_kernel(L, Tc, Bp),
        out_shape=jax.ShapeDtypeStruct((Bp, Op), jnp.float32),
        scratch_shapes=[pltpu.VMEM((Tc * Bp, H), jnp.float32),
                        pltpu.VMEM((Tc * Bp, H), jnp.float32)],
    )(x_tm, w0p, w1p, b0p, wihn, whh, brnnn, wfc_p, bfc_p)
    return out[:B, :O]


def init_params(key, input_size, hidden_size, num_layers, output_size):
    ks = jax.random.split(key, 9)
    s = 1.0 / jnp.sqrt(jnp.float32(hidden_size))
    u = lambda k, shape: jax.random.uniform(k, shape, jnp.float32, -s, s)

    # Conv1d weight (H, C, 2) split into the two taps, transposed for x @ W.
    conv_w = u(ks[0], (hidden_size, input_size, 2))
    w0 = conv_w[:, :, 0].T                               # (C, H)
    w1 = conv_w[:, :, 1].T                               # (C, H)
    bconv = u(ks[1], (1, hidden_size))

    # RNN weights; layer-0 input size == hidden_size (conv out channels), so all H x H.
    wih = u(ks[2], (num_layers, hidden_size, hidden_size))   # used as x @ wih[l]
    whh = u(ks[3], (num_layers, hidden_size, hidden_size))   # used as h @ whh[l]
    bih = u(ks[4], (num_layers, 1, hidden_size))
    bhh = u(ks[5], (num_layers, 1, hidden_size))

    # Linear
    wfc = u(ks[6], (hidden_size, output_size))
    bfc = u(ks[7], (1, output_size))
    return (w0, w1, bconv, wih, whh, bih, bhh, wfc, bfc)


def reference_forward(x, params):
    """Pure-JAX reference replicating the PyTorch forward semantics."""
    w0, w1, bconv, wih, whh, bih, bhh, wfc, bfc = params
    B, T, _ = x.shape
    H = w0.shape[1]
    L = wih.shape[0]
    # Conv1d(k=2)
    seq = (jnp.einsum("btc,ch->bth", x[:, :-1, :], w0)
           + jnp.einsum("btc,ch->bth", x[:, 1:, :], w1)
           + bconv[0])                                   # (B, T-1, H)
    # stacked tanh RNN, h0 = 0
    for l in range(L):
        h = jnp.zeros((B, H), jnp.float32)
        outs = []
        for t in range(seq.shape[1]):
            h = jnp.tanh(seq[:, t, :] @ wih[l] + bih[l, 0]
                         + h @ whh[l] + bhh[l, 0])
            outs.append(h)
        seq = jnp.stack(outs, axis=1)
    last = seq[:, -1, :]
    return last @ wfc + bfc[0]


if __name__ == "__main__":
    input_size, hidden_size, num_layers, output_size = 4, 32, 2, 5
    B, T = 2, 8

    key = jax.random.PRNGKey(0)
    kx, kp = jax.random.split(key)
    x = jax.random.normal(kx, (B, T, input_size), jnp.float32)
    params = init_params(kp, input_size, hidden_size, num_layers, output_size)

    out = jax.block_until_ready(cnn_rnn_forward(x, params))
    ref = jax.block_until_ready(reference_forward(x, params))

    assert out.shape == (B, output_size)
    assert jnp.allclose(out, ref, rtol=1e-3, atol=1e-3), (out, ref)
    print("KERNEL_OK")
</pallas_src>

<mosaic_0001>
module attributes {stable_mosaic.version = 11 : i64} {
  func.func @kernel(%arg0: memref<64x4xf32, #tpu.memory_space<vmem>>, %arg1: memref<4x32xf32, #tpu.memory_space<vmem>>, %arg2: memref<4x32xf32, #tpu.memory_space<vmem>>, %arg3: memref<1x32xf32, #tpu.memory_space<vmem>>, %arg4: memref<1x32x32xf32, #tpu.memory_space<vmem>>, %arg5: memref<2x32x32xf32, #tpu.memory_space<vmem>>, %arg6: memref<1x1x32xf32, #tpu.memory_space<vmem>>, %arg7: memref<32x128xf32, #tpu.memory_space<vmem>>, %arg8: memref<1x128xf32, #tpu.memory_space<vmem>>, %arg9: memref<8x128xf32, #tpu.memory_space<vmem>>, %arg10: memref<56x32xf32, #tpu.memory_space<vmem>>, %arg11: memref<56x32xf32, #tpu.memory_space<vmem>>) attributes {dimension_semantics = [], scalar_prefetch = 0 : i64, scratch_operands = 2 : i64, tpu.core_type = #tpu.core_type<tc>} {
    %c0 = arith.constant 0 : index
    %c0_0 = arith.constant 0 : index
    %0 = vector.load %arg0[%c0, %c0_0] : memref<64x4xf32, #tpu.memory_space<vmem>>, vector<56x4xf32>
    %c8 = arith.constant 8 : index
    %c0_1 = arith.constant 0 : index
    %1 = vector.load %arg0[%c8, %c0_1] : memref<64x4xf32, #tpu.memory_space<vmem>>, vector<56x4xf32>
    %c0_2 = arith.constant 0 : index
    %c0_3 = arith.constant 0 : index
    %2 = vector.load %arg1[%c0_2, %c0_3] : memref<4x32xf32, #tpu.memory_space<vmem>>, vector<4x32xf32>
    %cst = arith.constant dense<0.000000e+00> : vector<56x32xf32>
    %3 = tpu.matmul %0, %2, %cst {dimension_numbers = #tpu.dot_dimension_numbers<[1], [0], [0], [1], [0, 0, 1, 1], [], []>} : vector<56x4xf32>, vector<4x32xf32>, vector<56x32xf32> -> vector<56x32xf32>
    %c0_4 = arith.constant 0 : index
    %c0_5 = arith.constant 0 : index
    %4 = vector.load %arg2[%c0_4, %c0_5] : memref<4x32xf32, #tpu.memory_space<vmem>>, vector<4x32xf32>
    %cst_6 = arith.constant dense<0.000000e+00> : vector<56x32xf32>
    %5 = tpu.matmul %1, %4, %cst_6 {dimension_numbers = #tpu.dot_dimension_numbers<[1], [0], [0], [1], [0, 0, 1, 1], [], []>} : vector<56x4xf32>, vector<4x32xf32>, vector<56x32xf32> -> vector<56x32xf32>
    %6 = arith.addf %3, %5 : vector<56x32xf32>
    %c0_7 = arith.constant 0 : index
    %c0_8 = arith.constant 0 : index
    %7 = vector.load %arg3[%c0_7, %c0_8] : memref<1x32xf32, #tpu.memory_space<vmem>>, vector<1x32xf32>
    %8 = vector.broadcast %7 : vector<1x32xf32> to vector<56x32xf32>
    %9 = arith.addf %6, %8 : vector<56x32xf32>
    %c0_9 = arith.constant 0 : index
    %c0_10 = arith.constant 0 : index
    %10 = vector.load %arg10[%c0_9, %c0_10] : memref<56x32xf32, #tpu.memory_space<vmem>>, vector<56x32xf32>
    tpu.vector_store %arg10[%c0_9, %c0_10], %9 {strides = array<i32>} : memref<56x32xf32, #tpu.memory_space<vmem>>, vector<56x32xf32>,
    %c0_11 = arith.constant 0 : index
    %c0_12 = arith.constant 0 : index
    %c0_13 = arith.constant 0 : index
    %11 = vector.load %arg5[%c0_11, %c0_12, %c0_13] : memref<2x32x32xf32, #tpu.memory_space<vmem>>, vector<1x32x32xf32>
    %12 = vector.shape_cast %11 : vector<1x32x32xf32> to vector<32x32xf32>
    %c0_14 = arith.constant 0 : index
    %c0_15 = arith.constant 0 : index
    %c0_16 = arith.constant 0 : index
    %13 = vector.load %arg4[%c0_14, %c0_15, %c0_16] : memref<1x32x32xf32, #tpu.memory_space<vmem>>, vector<1x32x32xf32>
    %14 = vector.shape_cast %13 : vector<1x32x32xf32> to vector<32x32xf32>
    %c0_17 = arith.constant 0 : index
    %c0_18 = arith.constant 0 : index
    %c0_19 = arith.constant 0 : index
    %15 = vector.load %arg6[%c0_17, %c0_18, %c0_19] : memref<1x1x32xf32, #tpu.memory_space<vmem>>, vector<1x1x32xf32>
    %16 = vector.shape_cast %15 : vector<1x1x32xf32> to vector<1x32xf32>
    %cst_20 = arith.constant 0.000000e+00 : f32
    %17 = vector.broadcast %cst_20 : f32 to vector<8x32xf32>
    %c0_21 = arith.constant 0 : index
    %c0_22 = arith.constant 0 : index
    %18 = vector.load %arg10[%c0_21, %c0_22] : memref<56x32xf32, #tpu.memory_space<vmem>>, vector<8x32xf32>
    %cst_23 = arith.constant dense<0.000000e+00> : vector<8x32xf32>
    %19 = tpu.matmul %17, %12, %cst_23 {dimension_numbers = #tpu.dot_dimension_numbers<[1], [0], [0], [1], [0, 0, 1, 1], [], []>} : vector<8x32xf32>, vector<32x32xf32>, vector<8x32xf32> -> vector<8x32xf32>
    %20 = arith.addf %18, %19 : vector<8x32xf32>
    %21 = math.tanh %20 : vector<8x32xf32>
    %cst_24 = arith.constant dense<0.000000e+00> : vector<8x32xf32>
    %22 = tpu.matmul %21, %14, %cst_24 {dimension_numbers = #tpu.dot_dimension_numbers<[1], [0], [0], [1], [0, 0, 1, 1], [], []>} : vector<8x32xf32>, vector<32x32xf32>, vector<8x32xf32> -> vector<8x32xf32>
    %23 = vector.broadcast %16 : vector<1x32xf32> to vector<8x32xf32>
    %24 = arith.addf %22, %23 : vector<8x32xf32>
    %c0_25 = arith.constant 0 : index
    %c0_26 = arith.constant 0 : index
    %25 = vector.load %arg11[%c0_25, %c0_26] : memref<56x32xf32, #tpu.memory_space<vmem>>, vector<8x32xf32>
    tpu.vector_store %arg11[%c0_25, %c0_26], %24 {strides = array<i32>} : memref<56x32xf32, #tpu.memory_space<vmem>>, vector<8x32xf32>,
    %c8_27 = arith.constant 8 : index
    %c0_28 = arith.constant 0 : index
    %26 = vector.load %arg10[%c8_27, %c0_28] : memref<56x32xf32, #tpu.memory_space<vmem>>, vector<8x32xf32>
    %cst_29 = arith.constant dense<0.000000e+00> : vector<8x32xf32>
    %27 = tpu.matmul %21, %12, %cst_29 {dimension_numbers = #tpu.dot_dimension_numbers<[1], [0], [0], [1], [0, 0, 1, 1], [], []>} : vector<8x32xf32>, vector<32x32xf32>, vector<8x32xf32> -> vector<8x32xf32>
    %28 = arith.addf %26, %27 : vector<8x32xf32>
    %29 = math.tanh %28 : vector<8x32xf32>
    %cst_30 = arith.constant dense<0.000000e+00> : vector<8x32xf32>
    %30 = tpu.matmul %29, %14, %cst_30 {dimension_numbers = #tpu.dot_dimension_numbers<[1], [0], [0], [1], [0, 0, 1, 1], [], []>} : vector<8x32xf32>, vector<32x32xf32>, vector<8x32xf32> -> vector<8x32xf32>
    %31 = vector.broadcast %16 : vector<1x32xf32> to vector<8x32xf32>
    %32 = arith.addf %30, %31 : vector<8x32xf32>
    %c8_31 = arith.constant 8 : index
    %c0_32 = arith.constant 0 : index
    %33 = vector.load %arg11[%c8_31, %c0_32] : memref<56x32xf32, #tpu.memory_space<vmem>>, vector<8x32xf32>
    tpu.vector_store %arg11[%c8_31, %c0_32], %32 {strides = array<i32>} : memref<56x32xf32, #tpu.memory_space<vmem>>, vector<8x32xf32>,
    %c16 = arith.constant 16 : index
    %c0_33 = arith.constant 0 : index
    %34 = vector.load %arg10[%c16, %c0_33] : memref<56x32xf32, #tpu.memory_space<vmem>>, vector<8x32xf32>
    %cst_34 = arith.constant dense<0.000000e+00> : vector<8x32xf32>
    %35 = tpu.matmul %29, %12, %cst_34 {dimension_numbers = #tpu.dot_dimension_numbers<[1], [0], [0], [1], [0, 0, 1, 1], [], []>} : vector<8x32xf32>, vector<32x32xf32>, vector<8x32xf32> -> vector<8x32xf32>
    %36 = arith.addf %34, %35 : vector<8x32xf32>
    %37 = math.tanh %36 : vector<8x32xf32>
    %cst_35 = arith.constant dense<0.000000e+00> : vector<8x32xf32>
    %38 = tpu.matmul %37, %14, %cst_35 {dimension_numbers = #tpu.dot_dimension_numbers<[1], [0], [0], [1], [0, 0, 1, 1], [], []>} : vector<8x32xf32>, vector<32x32xf32>, vector<8x32xf32> -> vector<8x32xf32>
    %39 = vector.broadcast %16 : vector<1x32xf32> to vector<8x32xf32>
    %40 = arith.addf %38, %39 : vector<8x32xf32>
    %c16_36 = arith.constant 16 : index
    %c0_37 = arith.constant 0 : index
    %41 = vector.load %arg11[%c16_36, %c0_37] : memref<56x32xf32, #tpu.memory_space<vmem>>, vector<8x32xf32>
    tpu.vector_store %arg11[%c16_36, %c0_37], %40 {strides = array<i32>} : memref<56x32xf32, #tpu.memory_space<vmem>>, vector<8x32xf32>,
    %c24 = arith.constant 24 : index
    %c0_38 = arith.constant 0 : index
    %42 = vector.load %arg10[%c24, %c0_38] : memref<56x32xf32, #tpu.memory_space<vmem>>, vector<8x32xf32>
    %cst_39 = arith.constant dense<0.000000e+00> : vector<8x32xf32>
    %43 = tpu.matmul %37, %12, %cst_39 {dimension_numbers = #tpu.dot_dimension_numbers<[1], [0], [0], [1], [0, 0, 1, 1], [], []>} : vector<8x32xf32>, vector<32x32xf32>, vector<8x32xf32> -> vector<8x32xf32>
    %44 = arith.addf %42, %43 : vector<8x32xf32>
    %45 = math.tanh %44 : vector<8x32xf32>
    %cst_40 = arith.constant dense<0.000000e+00> : vector<8x32xf32>
    %46 = tpu.matmul %45, %14, %cst_40 {dimension_numbers = #tpu.dot_dimension_numbers<[1], [0], [0], [1], [0, 0, 1, 1], [], []>} : vector<8x32xf32>, vector<32x32xf32>, vector<8x32xf32> -> vector<8x32xf32>
    %47 = vector.broadcast %16 : vector<1x32xf32> to vector<8x32xf32>
    %48 = arith.addf %46, %47 : vector<8x32xf32>
    %c24_41 = arith.constant 24 : index
    %c0_42 = arith.constant 0 : index
    %49 = vector.load %arg11[%c24_41, %c0_42] : memref<56x32xf32, #tpu.memory_space<vmem>>, vector<8x32xf32>
    tpu.vector_store %arg11[%c24_41, %c0_42], %48 {strides = array<i32>} : memref<56x32xf32, #tpu.memory_space<vmem>>, vector<8x32xf32>,
    %c32 = arith.constant 32 : index
    %c0_43 = arith.constant 0 : index
    %50 = vector.load %arg10[%c32, %c0_43] : memref<56x32xf32, #tpu.memory_space<vmem>>, vector<8x32xf32>
    %cst_44 = arith.constant dense<0.000000e+00> : vector<8x32xf32>
    %51 = tpu.matmul %45, %12, %cst_44 {dimension_numbers = #tpu.dot_dimension_numbers<[1], [0], [0], [1], [0, 0, 1, 1], [], []>} : vector<8x32xf32>, vector<32x32xf32>, vector<8x32xf32> -> vector<8x32xf32>
    %52 = arith.addf %50, %51 : vector<8x32xf32>
    %53 = math.tanh %52 : vector<8x32xf32>
    %cst_45 = arith.constant dense<0.000000e+00> : vector<8x32xf32>
    %54 = tpu.matmul %53, %14, %cst_45 {dimension_numbers = #tpu.dot_dimension_numbers<[1], [0], [0], [1], [0, 0, 1, 1], [], []>} : vector<8x32xf32>, vector<32x32xf32>, vector<8x32xf32> -> vector<8x32xf32>
    %55 = vector.broadcast %16 : vector<1x32xf32> to vector<8x32xf32>
    %56 = arith.addf %54, %55 : vector<8x32xf32>
    %c32_46 = arith.constant 32 : index
    %c0_47 = arith.constant 0 : index
    %57 = vector.load %arg11[%c32_46, %c0_47] : memref<56x32xf32, #tpu.memory_space<vmem>>, vector<8x32xf32>
    tpu.vector_store %arg11[%c32_46, %c0_47], %56 {strides = array<i32>} : memref<56x32xf32, #tpu.memory_space<vmem>>, vector<8x32xf32>,
    %c40 = arith.constant 40 : index
    %c0_48 = arith.constant 0 : index
    %58 = vector.load %arg10[%c40, %c0_48] : memref<56x32xf32, #tpu.memory_space<vmem>>, vector<8x32xf32>
    %cst_49 = arith.constant dense<0.000000e+00> : vector<8x32xf32>
    %59 = tpu.matmul %53, %12, %cst_49 {dimension_numbers = #tpu.dot_dimension_numbers<[1], [0], [0], [1], [0, 0, 1, 1], [], []>} : vector<8x32xf32>, vector<32x32xf32>, vector<8x32xf32> -> vector<8x32xf32>
    %60 = arith.addf %58, %59 : vector<8x32xf32>
    %61 = math.tanh %60 : vector<8x32xf32>
    %cst_50 = arith.constant dense<0.000000e+00> : vector<8x32xf32>
    %62 = tpu.matmul %61, %14, %cst_50 {dimension_numbers = #tpu.dot_dimension_numbers<[1], [0], [0], [1], [0, 0, 1, 1], [], []>} : vector<8x32xf32>, vector<32x32xf32>, vector<8x32xf32> -> vector<8x32xf32>
    %63 = vector.broadcast %16 : vector<1x32xf32> to vector<8x32xf32>
    %64 = arith.addf %62, %63 : vector<8x32xf32>
    %c40_51 = arith.constant 40 : index
    %c0_52 = arith.constant 0 : index
    %65 = vector.load %arg11[%c40_51, %c0_52] : memref<56x32xf32, #tpu.memory_space<vmem>>, vector<8x32xf32>
    tpu.vector_store %arg11[%c40_51, %c0_52], %64 {strides = array<i32>} : memref<56x32xf32, #tpu.memory_space<vmem>>, vector<8x32xf32>,
    %c48 = arith.constant 48 : index
    %c0_53 = arith.constant 0 : index
    %66 = vector.load %arg10[%c48, %c0_53] : memref<56x32xf32, #tpu.memory_space<vmem>>, vector<8x32xf32>
    %cst_54 = arith.constant dense<0.000000e+00> : vector<8x32xf32>
    %67 = tpu.matmul %61, %12, %cst_54 {dimension_numbers = #tpu.dot_dimension_numbers<[1], [0], [0], [1], [0, 0, 1, 1], [], []>} : vector<8x32xf32>, vector<32x32xf32>, vector<8x32xf32> -> vector<8x32xf32>
    %68 = arith.addf %66, %67 : vector<8x32xf32>
    %69 = math.tanh %68 : vector<8x32xf32>
    %cst_55 = arith.constant dense<0.000000e+00> : vector<8x32xf32>
    %70 = tpu.matmul %69, %14, %cst_55 {dimension_numbers = #tpu.dot_dimension_numbers<[1], [0], [0], [1], [0, 0, 1, 1], [], []>} : vector<8x32xf32>, vector<32x32xf32>, vector<8x32xf32> -> vector<8x32xf32>
    %71 = vector.broadcast %16 : vector<1x32xf32> to vector<8x32xf32>
    %72 = arith.addf %70, %71 : vector<8x32xf32>
    %c48_56 = arith.constant 48 : index
    %c0_57 = arith.constant 0 : index
    %73 = vector.load %arg11[%c48_56, %c0_57] : memref<56x32xf32, #tpu.memory_space<vmem>>, vector<8x32xf32>
    tpu.vector_store %arg11[%c48_56, %c0_57], %72 {strides = array<i32>} : memref<56x32xf32, #tpu.memory_space<vmem>>, vector<8x32xf32>,
    %c1 = arith.constant 1 : index
    %c0_58 = arith.constant 0 : index
    %c0_59 = arith.constant 0 : index
    %74 = vector.load %arg5[%c1, %c0_58, %c0_59] : memref<2x32x32xf32, #tpu.memory_space<vmem>>, vector<1x32x32xf32>
    %75 = vector.shape_cast %74 : vector<1x32x32xf32> to vector<32x32xf32>
    %cst_60 = arith.constant 0.000000e+00 : f32
    %76 = vector.broadcast %cst_60 : f32 to vector<8x32xf32>
    %c0_61 = arith.constant 0 : index
    %c0_62 = arith.constant 0 : index
    %77 = vector.load %arg11[%c0_61, %c0_62] : memref<56x32xf32, #tpu.memory_space<vmem>>, vector<8x32xf32>
    %cst_63 = arith.constant dense<0.000000e+00> : vector<8x32xf32>
    %78 = tpu.matmul %76, %75, %cst_63 {dimension_numbers = #tpu.dot_dimension_numbers<[1], [0], [0], [1], [0, 0, 1, 1], [], []>} : vector<8x32xf32>, vector<32x32xf32>, vector<8x32xf32> -> vector<8x32xf32>
    %79 = arith.addf %77, %78 : vector<8x32xf32>
    %80 = math.tanh %79 : vector<8x32xf32>
    %c8_64 = arith.constant 8 : index
    %c0_65 = arith.constant 0 : index
    %81 = vector.load %arg11[%c8_64, %c0_65] : memref<56x32xf32, #tpu.memory_space<vmem>>, vector<8x32xf32>
    %cst_66 = arith.constant dense<0.000000e+00> : vector<8x32xf32>
    %82 = tpu.matmul %80, %75, %cst_66 {dimension_numbers = #tpu.dot_dimension_numbers<[1], [0], [0], [1], [0, 0, 1, 1], [], []>} : vector<8x32xf32>, vector<32x32xf32>, vector<8x32xf32> -> vector<8x32xf32>
    %83 = arith.addf %81, %82 : vector<8x32xf32>
    %84 = math.tanh %83 : vector<8x32xf32>
    %c16_67 = arith.constant 16 : index
    %c0_68 = arith.constant 0 : index
    %85 = vector.load %arg11[%c16_67, %c0_68] : memref<56x32xf32, #tpu.memory_space<vmem>>, vector<8x32xf32>
    %cst_69 = arith.constant dense<0.000000e+00> : vector<8x32xf32>
    %86 = tpu.matmul %84, %75, %cst_69 {dimension_numbers = #tpu.dot_dimension_numbers<[1], [0], [0], [1], [0, 0, 1, 1], [], []>} : vector<8x32xf32>, vector<32x32xf32>, vector<8x32xf32> -> vector<8x32xf32>
    %87 = arith.addf %85, %86 : vector<8x32xf32>
    %88 = math.tanh %87 : vector<8x32xf32>
    %c24_70 = arith.constant 24 : index
    %c0_71 = arith.constant 0 : index
    %89 = vector.load %arg11[%c24_70, %c0_71] : memref<56x32xf32, #tpu.memory_space<vmem>>, vector<8x32xf32>
    %cst_72 = arith.constant dense<0.000000e+00> : vector<8x32xf32>
    %90 = tpu.matmul %88, %75, %cst_72 {dimension_numbers = #tpu.dot_dimension_numbers<[1], [0], [0], [1], [0, 0, 1, 1], [], []>} : vector<8x32xf32>, vector<32x32xf32>, vector<8x32xf32> -> vector<8x32xf32>
    %91 = arith.addf %89, %90 : vector<8x32xf32>
    %92 = math.tanh %91 : vector<8x32xf32>
    %c32_73 = arith.constant 32 : index
    %c0_74 = arith.constant 0 : index
    %93 = vector.load %arg11[%c32_73, %c0_74] : memref<56x32xf32, #tpu.memory_space<vmem>>, vector<8x32xf32>
    %cst_75 = arith.constant dense<0.000000e+00> : vector<8x32xf32>
    %94 = tpu.matmul %92, %75, %cst_75 {dimension_numbers = #tpu.dot_dimension_numbers<[1], [0], [0], [1], [0, 0, 1, 1], [], []>} : vector<8x32xf32>, vector<32x32xf32>, vector<8x32xf32> -> vector<8x32xf32>
    %95 = arith.addf %93, %94 : vector<8x32xf32>
    %96 = math.tanh %95 : vector<8x32xf32>
    %c40_76 = arith.constant 40 : index
    %c0_77 = arith.constant 0 : index
    %97 = vector.load %arg11[%c40_76, %c0_77] : memref<56x32xf32, #tpu.memory_space<vmem>>, vector<8x32xf32>
    %cst_78 = arith.constant dense<0.000000e+00> : vector<8x32xf32>
    %98 = tpu.matmul %96, %75, %cst_78 {dimension_numbers = #tpu.dot_dimension_numbers<[1], [0], [0], [1], [0, 0, 1, 1], [], []>} : vector<8x32xf32>, vector<32x32xf32>, vector<8x32xf32> -> vector<8x32xf32>
    %99 = arith.addf %97, %98 : vector<8x32xf32>
    %100 = math.tanh %99 : vector<8x32xf32>
    %c48_79 = arith.constant 48 : index
    %c0_80 = arith.constant 0 : index
    %101 = vector.load %arg11[%c48_79, %c0_80] : memref<56x32xf32, #tpu.memory_space<vmem>>, vector<8x32xf32>
    %cst_81 = arith.constant dense<0.000000e+00> : vector<8x32xf32>
    %102 = tpu.matmul %100, %75, %cst_81 {dimension_numbers = #tpu.dot_dimension_numbers<[1], [0], [0], [1], [0, 0, 1, 1], [], []>} : vector<8x32xf32>, vector<32x32xf32>, vector<8x32xf32> -> vector<8x32xf32>
    %103 = arith.addf %101, %102 : vector<8x32xf32>
    %104 = math.tanh %103 : vector<8x32xf32>
    %c0_82 = arith.constant 0 : index
    %c0_83 = arith.constant 0 : index
    %105 = vector.load %arg7[%c0_82, %c0_83] : memref<32x128xf32, #tpu.memory_space<vmem>>, vector<32x128xf32>
    %cst_84 = arith.constant dense<0.000000e+00> : vector<8x128xf32>
    %106 = tpu.matmul %104, %105, %cst_84 {dimension_numbers = #tpu.dot_dimension_numbers<[1], [0], [0], [1], [0, 0, 1, 1], [], []>} : vector<8x32xf32>, vector<32x128xf32>, vector<8x128xf32> -> vector<8x128xf32>
    %c0_85 = arith.constant 0 : index
    %c0_86 = arith.constant 0 : index
    %107 = vector.load %arg8[%c0_85, %c0_86] : memref<1x128xf32, #tpu.memory_space<vmem>>, vector<1x128xf32>
    %108 = vector.broadcast %107 : vector<1x128xf32> to vector<8x128xf32>
    %109 = arith.addf %106, %108 : vector<8x128xf32>
    %c0_87 = arith.constant 0 : index
    %c0_88 = arith.constant 0 : index
    %110 = vector.load %arg9[%c0_87, %c0_88] : memref<8x128xf32, #tpu.memory_space<vmem>>, vector<8x128xf32>
    tpu.vector_store %arg9[%c0_87, %c0_88], %109 {strides = array<i32>} : memref<8x128xf32, #tpu.memory_space<vmem>>, vector<8x128xf32>,
    return
  }
}

</mosaic_0001>

<bundles_post_ra>
// kernel: tpu_custom_call.1
= control target key start
LH: loop header
LB: loop body
LE: loop exit
PB: predicated region body
PF: predicated region fallthrough
CT: control target
= control target key end

     0   :  { %14 = vsyncpa [#allocation5], 0  ;;  %s3092_s0 = inlined_call_operand.vmem [shape: f32[64,4], index: 0, kind: input, shape index: {}]   ;;  %s3093_s1 = inlined_call_operand.vmem [shape: f32[4,32], index: 1, kind: input, shape index: {}]   ;;  %s3094_s2 = inlined_call_operand.vmem [shape: f32[4,32], index: 2, kind: input, shape index: {}]   ;;  %s3095_s3 = inlined_call_operand.vmem [shape: f32[1,32], index: 3, kind: input, shape index: {}]   ;;  %s3096_s4 = inlined_call_operand.hbm [shape: f32[1,32,32], index: 4, kind: input, shape index: {}]   ;;  %s3097_s5 = inlined_call_operand.vmem [shape: f32[2,32,32], index: 5, kind: input, shape index: {}]   ;;  %s3098_s6 = inlined_call_operand.vmem [shape: f32[1,1,32], index: 6, kind: input, shape index: {}]   ;;  %s3099_s7 = inlined_call_operand.hbm [shape: f32[32,128], index: 7, kind: input, shape index: {}]   ;;  %s3100_s8 = inlined_call_operand.vmem [shape: f32[1,128], index: 8, kind: input, shape index: {}]   ;;  %s3101_s9 = inlined_call_operand.hbm [shape: f32[8,128], index: 9, kind: output, shape index: {}]  }
   0x1   :  { %15 = vsyncpa [#allocation8], 0 }
   0x2   :  { %16 = vsyncpa [#allocation6], 0  ;;  %s2704_s30 = smov [#allocation4]   ;;  %s2632_s13 = scalar_lea.hbm %s3096_s4, 512 }
   0x3   :  { %s30_s10 = sshll.u32 %s2704_s30, 4  ;;  %p2633_p0 = scmp.ne.s32.totalorder %s3096_s4, %s2632_s13  ;;  %s31_s10 = int_to_ptr.vmem [resolvable:$true] %s30_s10 }
   0x4   :  { %p2636_p1 = scmp.lt.u32.totalorder %s2632_s13, %s3096_s4 }
   0x6   :  { %p2638_p2 = pnand %p2636_p1, %p2633_p0 }
   0x8   :  { %2641 = shalt.err (!%p2638_p2)
}
   0x9   :  { %s2642_s18 = scalar_lea.vmem %s31_s10, 512  ;;  %p2647_p4 = scmp.lt.s32.totalorder %s31_s10, %s31_s10 }
   0xa   :  { %p2643_p3 = scmp.ne.s32.totalorder %s31_s10, %s2642_s18  ;;  %p2648_p5 = scmp.lt.s32.totalorder %s2642_s18, %s2642_s18 }
   0xc   :  { %p2649_p6 = por %p2648_p5, %p2647_p4 }
   0xe   :  { %p2650_p7 = pnand %p2649_p6, %p2643_p3 }
  0x10   :  { %2653 = shalt.err (!%p2650_p7)
}
  0x11   :  { %s2705_s19 = smov 128   ;;  %s2706_s20 = smov 8  }
  0x12   :  { %36 = dma.hbm_to_vmem [thread:$0]  %s3096_s4, 512, %s31_s10, [#allocation5], %s2705_s19, %s2705_s19, %s2706_s20  }
  0x13   :  { %s2707_s23 = smov [#allocation7]   ;;  %s2654_s27 = scalar_lea.hbm %s3099_s7, 512 }
  0x14   :  { %s46_s24 = sshll.u32 %s2707_s23, 4  ;;  %p2655_p8 = scmp.ne.s32.totalorder %s3099_s7, %s2654_s27  ;;  %s47_s24 = int_to_ptr.vmem [resolvable:$true] %s46_s24 }
  0x15   :  { %p2658_p9 = scmp.lt.u32.totalorder %s2654_s27, %s3099_s7 }
  0x17   :  { %p2660_p10 = pnand %p2658_p9, %p2655_p8 }
  0x19   :  { %2663 = shalt.err (!%p2660_p10)
}
  0x1a   :  { %s2664_s12 = scalar_lea.vmem %s47_s24, 512  ;;  %p2669_p12 = scmp.lt.s32.totalorder %s47_s24, %s47_s24 }
  0x1b   :  { %p2665_p11 = scmp.ne.s32.totalorder %s47_s24, %s2664_s12  ;;  %p2670_p13 = scmp.lt.s32.totalorder %s2664_s12, %s2664_s12 }
  0x1d   :  { %p2671_p0 = por %p2670_p13, %p2669_p12 }
  0x1f   :  { %p2672_p1 = pnand %p2671_p0, %p2665_p11 }
  0x21   :  { %2675 = shalt.err (!%p2672_p1)
}
  0x22   :  { %52 = dma.hbm_to_vmem [thread:$0]  %s3099_s7, 512, %s47_s24, [#allocation8], %s2705_s19, %s2705_s19, %s2706_s20  }
  0x23   :  { %2698 = dma.done.wait [#allocation5], 512  }
  0x24   :  { %2699 = vsyncadd [#allocation5], 4294966784 }
  0x25   :  { %2700 = dma.done.wait [#allocation8], 512  }
  0x26   :  { %2701 = vsyncadd [#allocation8], 4294966784  ;;  %v2708_v0 = vmov 0.0   ;;  %vm2709_vm0 = vmmov 0   ;;  %vm93_vm1 = vcmask 1043456   ;;  %vm71_vm2 = vcmask 31744  }
  0x27   :  { %2176 = vmatprep.subr.mxu0 %v2708_v0  ;;  %2178 = vmatprep.mubr.msk.f32.mxu0 %vm2709_vm0, %v2708_v0  ;;  %v70_v1 = vld [vmem:[%s3094_s2] sm:$0xf]  ;;  %v62_v2 = vld [vmem:[%s3092_s0 + $0x8] sm:$0xff]  ;;  %v2710_v7 = vmov 0.0|0.0   ;;  %v63_v9 = vld [vmem:[%s3092_s0 + $0x10] sm:$0xff]  ;;  %vm317_vm3 = vcmask 261120  }
  0x28   :  { %2199 = vmatprep.subr.mxu1 %v2708_v0  ;;  %2201 = vmatprep.mubr.msk.f32.mxu1 %vm2709_vm0, %v2708_v0  ;;  %v69_v3 = vld [vmem:[%s3093_s1] sm:$0xf]  ;;  %v326_v6 = vld [vmem:[%s3097_s5 + $0x8] sm:$0xff]  ;;  %v327_v10 = vld [vmem:[%s3097_s5 + $0x10] sm:$0xff]  ;;  %s2711_s23 = smov [#allocation9]  }
  0x29   :  { %2177 = vmatpush3.msk.msra.mxu0 %vm93_vm1, %v70_v1  ;;  %2200 = vmatpush3.msk.msra.mxu1 %vm93_vm1, %v69_v3  ;;  %v61_v4 = vld [vmem:[%s3092_s0] sm:$0xff]  ;;  %v328_v11 = vld [vmem:[%s3097_s5 + $0x18] sm:$0xff]  ;;  %v66_v15 = vld [vmem:[%s3092_s0 + $0x28] sm:$0xff]  ;;  %s1997_s24 = sshll.u32 %s2711_s23, 4  ;;  %s1998_s24 = int_to_ptr.vmem [resolvable:$true] %s1997_s24 }
  0x2a   :  { %v325_v5 = vld [vmem:[%s3097_s5] sm:$0xff]  ;;  %2179 = vmatmul.mubr.msk.f32.vlgmr.msra.gmra.mrb[0].mxu0 %vm71_vm2, %v62_v2  ;;  %2464 = vmatprep.subr.bf16.mxu0 %v2710_v7  ;;  %v2829_v12 = vpack.c.bf16 %v328_v11, %v327_v10  ;;  %v64_v13 = vld [vmem:[%s3092_s0 + $0x18] sm:$0xff]  ;;  %v67_v16 = vld [vmem:[%s3092_s0 + $0x30] sm:$0xff]  ;;  %s2676_s25 = scalar_lea.vmem %s1998_s24, 128  ;;  %p2681_p3 = scmp.lt.s32.totalorder %s1998_s24, %s1998_s24 }
  0x2b   :  { %v2812_v8 = vpack.c.bf16 %v326_v6, %v325_v5  ;;  %2202 = vmatmul.mubr.msk.f32.vlgmr.msra.gmra.mrb[0].mxu1 %vm71_vm2, %v61_v4  ;;  %2181 = vmatprep.mubr.msk.f32.mxu0 %vm2709_vm0, %v2708_v0  ;;  %v65_v14 = vld [vmem:[%s3092_s0 + $0x20] sm:$0xff]  ;;  %v68_v17 = vld [vmem:[%s3092_s0 + $0x38] sm:$0xff]  ;;  %v329_v18 = vld [vmem:[#allocation4] sm:$0xff]  ;;  %p2677_p2 = scmp.ne.s32.totalorder %s1998_s24, %s2676_s25  ;;  %p2682_p4 = scmp.lt.s32.totalorder %s2676_s25, %s2676_s25 }
  0x2c   :  { %2204 = vmatprep.mubr.msk.f32.mxu1 %vm2709_vm0, %v2708_v0  ;;  %2470 = vmatprep.subr.bf16.mxu1 %v2710_v7  ;;  %v330_v19 = vld [vmem:[#allocation4 + $0x8] sm:$0xff]  ;;  %v331_v20 = vld [vmem:[#allocation4 + $0x10] sm:$0xff]  ;;  %v332_v22 = vld [vmem:[#allocation4 + $0x18] sm:$0xff] }
  0x2d   :  { %2466 = vmatpush3.bf16.msra.mxu0 %v2812_v8  ;;  %v2893_v21 = vpack.c.bf16 %v330_v19, %v329_v18  ;;  %v2896_v23 = vpack.c.bf16 %v332_v22, %v331_v20  ;;  %v2023_v27 = vld [vmem:[%s3095_s3] ss:$0 sm:$0xff]  ;;  %p2683_p5 = por %p2682_p4, %p2681_p3 }
  0x2e   :  { %2467 = vmatprep.subr.bf16.mxu0 %v2710_v7  ;;  %2182 = vmatmul.mubr.msk.f32.gmra.mrb[2].mxu0 %vm71_vm2, %v63_v9  ;;  %v2928_v11 = vld [vmem:[%s3098_s6] ss:$0 sm:$0xff] }
  0x2f   :  { %2205 = vmatmul.mubr.msk.f32.gmra.mrb[2].mxu1 %vm71_vm2, %v62_v2  ;;  %2184 = vmatprep.mubr.msk.f32.mxu0 %vm2709_vm0, %v2708_v0  ;;  %p2684_p6 = pnand %p2683_p5, %p2677_p2 }
  0x30   :  { %2207 = vmatprep.mubr.msk.f32.mxu1 %vm2709_vm0, %v2708_v0  ;;  %2472 = vmatpush3.bf16.msra.mxu1 %v2893_v21 }
  0x31   :  { %2469 = vmatpush3.bf16.msra.mxu0 %v2829_v12  ;;  %2473 = vmatprep.subr.bf16.mxu1 %v2710_v7 }
  0x32   :  { %2476 = vmatprep.subr.bf16.mxu0 %v2710_v7  ;;  %2185 = vmatmul.mubr.msk.f32.gmra.mrb[4].mxu0 %vm71_vm2, %v64_v13 }
  0x33   :  { %2208 = vmatmul.mubr.msk.f32.gmra.mrb[4].mxu1 %vm71_vm2, %v63_v9  ;;  %2187 = vmatprep.mubr.msk.f32.mxu0 %vm2709_vm0, %v2708_v0 }
  0x34   :  { %2210 = vmatprep.mubr.msk.f32.mxu1 %vm2709_vm0, %v2708_v0  ;;  %2475 = vmatpush3.bf16.msra.mxu1 %v2896_v23 }
  0x35   :  { %2482 = vmatprep.subr.bf16.mxu1 %v2710_v7 }
  0x36   :  { %2188 = vmatmul.mubr.msk.f32.gmra.mrb[6].mxu0 %vm71_vm2, %v65_v14 }
  0x37   :  { %2211 = vmatmul.mubr.msk.f32.gmra.mrb[6].mxu1 %vm71_vm2, %v64_v13  ;;  %2190 = vmatprep.mubr.msk.f32.mxu0 %vm2709_vm0, %v2708_v0 }
  0x38   :  { %2213 = vmatprep.mubr.msk.f32.mxu1 %vm2709_vm0, %v2708_v0 }
  0x3a   :  { %2191 = vmatmul.mubr.msk.f32.gmra.mrb[8].mxu0 %vm71_vm2, %v66_v15 }
  0x3b   :  { %2214 = vmatmul.mubr.msk.f32.gmra.mrb[8].mxu1 %vm71_vm2, %v65_v14  ;;  %2193 = vmatprep.mubr.msk.f32.mxu0 %vm2709_vm0, %v2708_v0 }
  0x3c   :  { %2216 = vmatprep.mubr.msk.f32.mxu1 %vm2709_vm0, %v2708_v0 }
  0x3e   :  { %2194 = vmatmul.mubr.msk.f32.gmra.mrb[10].mxu0 %vm71_vm2, %v67_v16 }
  0x3f   :  { %2217 = vmatmul.mubr.msk.f32.gmra.mrb[10].mxu1 %vm71_vm2, %v66_v15  ;;  %2196 = vmatprep.mubr.msk.f32.mxu0 %vm2709_vm0, %v2708_v0 }
  0x40   :  { %2219 = vmatprep.mubr.msk.f32.mxu1 %vm2709_vm0, %v2708_v0 }
  0x42   :  { %2197 = vmatmul.mubr.msk.f32.gmra.mrb[12].mxu0 %vm71_vm2, %v68_v17 }
  0x43   :  { %2220 = vmatmul.mubr.msk.f32.gmra.mrb[12].mxu1 %vm71_vm2, %v67_v16  ;;  %2230 = vmatprep.mubr.msk.f32.mxu0 %vm2709_vm0, %v2708_v0 }
  0x44   :  { %2241 = vmatprep.mubr.msk.f32.mxu1 %vm2709_vm0, %v2708_v0 }
  0x46   :  { %2231 = vmatmul.mubr.f32.vlgmr.msra.gmra.mrb[14].mxu0 %v2708_v0 }
  0x47   :  { %2478 = vmatpush3.bf16.msra.mxu0 %v2812_v8  ;;  %2252 = vmatprep.mubr.msk.f32.mxu0 %vm2709_vm0, %v2708_v0 }
  0x48   :  { %2479 = vmatprep.subr.bf16.mxu0 %v2710_v7 }
  0x4b   :  { %2481 = vmatpush3.bf16.msra.mxu0 %v2829_v12 }
  0x4c   :  { %2488 = vmatprep.subr.bf16.mxu0 %v2710_v7 }
  0xfd   :  { %v163_v24 = vpop.f32.mrb[0].mxu0 }
  0xfe   :  { %v2180_v25 = vpop.f32.mrb[1].mxu0  ;;  %v269_v26 = vpop.f32.mrb[0].mxu1 }
  0xff   :  { %v270_v28 = vadd.f32 %v269_v26, %v163_v24  ;;  %v2203_v29 = vpop.f32.mrb[1].mxu1 }
 0x101   :  { %v310_v30 = vadd.f32 %v2023_v27, %v270_v28  ;;  %v168_v31 = vpop.f32.mrb[2].mxu0 }
 0x102   :  { %v2183_v32 = vpop.f32.mrb[3].mxu0  ;;  %v274_v33 = vpop.f32.mrb[2].mxu1 }
 0x103   :  { %318 = vst.msk [vmem:[#allocation2] sm:$0xff] %vm317_vm3, %v310_v30  ;;  %v275_v34 = vadd.f32 %v274_v33, %v168_v31  ;;  %v2206_v35 = vpop.f32.mrb[3].mxu1 }
 0x105   :  { %v311_v36 = vadd.f32 %v2023_v27, %v275_v34  ;;  %v173_v37 = vpop.f32.mrb[4].mxu0 }
 0x106   :  { %v2186_v38 = vpop.f32.mrb[5].mxu0  ;;  %v279_v39 = vpop.f32.mrb[4].mxu1 }
 0x107   :  { %319 = vst.msk [vmem:[#allocation2 + $0x8] sm:$0xff] %vm317_vm3, %v311_v36  ;;  %v280_v40 = vadd.f32 %v279_v39, %v173_v37  ;;  %v2209_v41 = vpop.f32.mrb[5].mxu1 }
 0x109   :  { %v312_v42 = vadd.f32 %v2023_v27, %v280_v40  ;;  %v178_v43 = vpop.f32.mrb[6].mxu0 }
 0x10a   :  { %v2189_v44 = vpop.f32.mrb[7].mxu0  ;;  %v284_v45 = vpop.f32.mrb[6].mxu1  ;;  %v334_v4 = vld [vmem:[#allocation2] sm:$0xff] }
 0x10b   :  { %320 = vst.msk [vmem:[#allocation2 + $0x10] sm:$0xff] %vm317_vm3, %v312_v42  ;;  %v285_v46 = vadd.f32 %v284_v45, %v178_v43  ;;  %v2212_v47 = vpop.f32.mrb[7].mxu1 }
 0x10d   :  { %v313_v48 = vadd.f32 %v2023_v27, %v285_v46  ;;  %v183_v49 = vpop.f32.mrb[8].mxu0 }
 0x10e   :  { %v2192_v50 = vpop.f32.mrb[9].mxu0  ;;  %v289_v51 = vpop.f32.mrb[8].mxu1  ;;  %v490_v14 = vld [vmem:[#allocation2 + $0x8] sm:$0xff] }
 0x10f   :  { %321 = vst.msk [vmem:[#allocation2 + $0x18] sm:$0xff] %vm317_vm3, %v313_v48  ;;  %v290_v52 = vadd.f32 %v289_v51, %v183_v49  ;;  %v2215_v53 = vpop.f32.mrb[9].mxu1 }
 0x110   :  { %v2039_v53 = vld [vmem:[%s3097_s5 + $0x28] sm:$0xff] }
 0x111   :  { %v314_v54 = vadd.f32 %v2023_v27, %v290_v52  ;;  %v188_v55 = vpop.f32.mrb[10].mxu0 }
 0x112   :  { %v2195_v56 = vpop.f32.mrb[11].mxu0  ;;  %v294_v57 = vpop.f32.mrb[10].mxu1  ;;  %v637_v24 = vld [vmem:[#allocation2 + $0x10] sm:$0xff] }
 0x113   :  { %322 = vst.msk [vmem:[#allocation2 + $0x20] sm:$0xff] %vm317_vm3, %v314_v54  ;;  %v295_v58 = vadd.f32 %v294_v57, %v188_v55  ;;  %v2218_v59 = vpop.f32.mrb[11].mxu1  ;;  %v2040_v55 = vld [vmem:[%s3097_s5 + $0x30] sm:$0xff]  ;;  %v2041_v56 = vld [vmem:[%s3097_s5 + $0x38] sm:$0xff] }
 0x115   :  { %v315_v60 = vadd.f32 %v2023_v27, %v295_v58  ;;  %v193_v61 = vpop.f32.mrb[12].mxu0  ;;  %v3013_v58 = vpack.c.bf16 %v2041_v56, %v2040_v55 }
 0x116   :  { %v2198_v62 = vpop.f32.mrb[13].mxu0  ;;  %v299_v63 = vpop.f32.mrb[12].mxu1  ;;  %v784_v32 = vld [vmem:[#allocation2 + $0x18] sm:$0xff] }
 0x117   :  { %323 = vst.msk [vmem:[#allocation2 + $0x28] sm:$0xff] %vm317_vm3, %v315_v60  ;;  %v300_v1 = vadd.f32 %v299_v63, %v193_v61  ;;  %v2221_v2 = vpop.f32.mrb[13].mxu1 }
 0x119   :  { %v316_v3 = vadd.f32 %v2023_v27, %v300_v1  ;;  %v404_v5 = vpop.f32.mrb[14].mxu0 }
 0x11a   :  { %v408_v6 = vadd.f32 %v404_v5, %v334_v4  ;;  %v2232_v9 = vpop.f32.mrb[15].mxu0  ;;  %v931_v40 = vld [vmem:[#allocation2 + $0x20] sm:$0xff] }
 0x11b   :  { %324 = vst.msk [vmem:[#allocation2 + $0x30] sm:$0xff] %vm317_vm3, %v316_v3 }
 0x11c   :  { %2604 = vtanh.f32 %v408_v6 }
 0x11e   :  { %v1078_v47 = vld [vmem:[#allocation2 + $0x28] sm:$0xff] }
 0x122   :  { %v1225_v59 = vld [vmem:[#allocation2 + $0x30] sm:$0xff] }
 0x126   :  { %v2605_v10 = vpop.eup %2604 }
 0x127   :  { %2242 = vmatmul.mubr.msk.f32.vlgmr.msra.gmra.mrb[14].mxu1 %vm317_vm3, %v2605_v10  ;;  %2253 = vmatmul.mubr.msk.f32.vlgmr.msra.gmra.mrb[16].mxu0 %vm317_vm3, %v2605_v10 }
 0x128   :  { %2484 = vmatpush3.bf16.msra.mxu1 %v2893_v21  ;;  %2490 = vmatpush3.bf16.msra.mxu0 %v2812_v8 }
 0x129   :  { %2485 = vmatprep.subr.bf16.mxu1 %v2710_v7  ;;  %2491 = vmatprep.subr.bf16.mxu0 %v2710_v7 }
 0x12a   :  { %2263 = vmatprep.mubr.msk.f32.mxu1 %vm2709_vm0, %v2708_v0  ;;  %2274 = vmatprep.mubr.msk.f32.mxu0 %vm2709_vm0, %v2708_v0 }
 0x12c   :  { %2487 = vmatpush3.bf16.msra.mxu1 %v2896_v23  ;;  %2493 = vmatpush3.bf16.msra.mxu0 %v2829_v12 }
 0x12d   :  { %2494 = vmatprep.subr.bf16.mxu1 %v2710_v7  ;;  %2500 = vmatprep.subr.bf16.mxu0 %v2710_v7 }
 0x1fa   :  { %v485_v13 = vpop.f32.mrb[14].mxu1  ;;  %v557_v15 = vpop.f32.mrb[16].mxu0 }
 0x1fb   :  { %v486_v16 = vadd.f32 %v2928_v11, %v485_v13  ;;  %v561_v17 = vadd.f32 %v557_v15, %v490_v14  ;;  %v2243_v18 = vpop.f32.mrb[15].mxu1  ;;  %v2254_v19 = vpop.f32.mrb[17].mxu0 }
 0x1fd   :  { %489 = vst.msk [vmem:[#allocation3] sm:$0xff] %vm317_vm3, %v486_v16  ;;  %2606 = vtanh.f32 %v561_v17 }
 0x204   :  { %v1377_v1 = vld [vmem:[#allocation3] sm:$0xff] }
 0x207   :  { %v2607_v20 = vpop.eup %2606 }
 0x208   :  { %2264 = vmatmul.mubr.msk.f32.vlgmr.msra.gmra.mrb[16].mxu1 %vm317_vm3, %v2607_v20  ;;  %2275 = vmatmul.mubr.msk.f32.vlgmr.msra.gmra.mrb[18].mxu0 %vm317_vm3, %v2607_v20 }
 0x209   :  { %2496 = vmatpush3.bf16.msra.mxu1 %v2893_v21  ;;  %2502 = vmatpush3.bf16.msra.mxu0 %v2812_v8 }
 0x20a   :  { %2497 = vmatprep.subr.bf16.mxu1 %v2710_v7  ;;  %2503 = vmatprep.subr.bf16.mxu0 %v2710_v7 }
 0x20b   :  { %2285 = vmatprep.mubr.msk.f32.mxu1 %vm2709_vm0, %v2708_v0  ;;  %2296 = vmatprep.mubr.msk.f32.mxu0 %vm2709_vm0, %v2708_v0 }
 0x20d   :  { %2499 = vmatpush3.bf16.msra.mxu1 %v2896_v23  ;;  %2505 = vmatpush3.bf16.msra.mxu0 %v2829_v12 }
 0x20e   :  { %2506 = vmatprep.subr.bf16.mxu1 %v2710_v7  ;;  %2512 = vmatprep.subr.bf16.mxu0 %v2710_v7 }
 0x2db   :  { %v632_v22 = vpop.f32.mrb[16].mxu1  ;;  %v704_v25 = vpop.f32.mrb[18].mxu0 }
 0x2dc   :  { %v633_v26 = vadd.f32 %v2928_v11, %v632_v22  ;;  %v708_v27 = vadd.f32 %v704_v25, %v637_v24  ;;  %v2265_v28 = vpop.f32.mrb[17].mxu1  ;;  %v2276_v29 = vpop.f32.mrb[19].mxu0 }
 0x2de   :  { %636 = vst.msk [vmem:[#allocation3 + $0x8] sm:$0xff] %vm317_vm3, %v633_v26  ;;  %2608 = vtanh.f32 %v708_v27 }
 0x2e5   :  { %v1450_v14 = vld [vmem:[#allocation3 + $0x8] sm:$0xff] }
 0x2e8   :  { %v2609_v30 = vpop.eup %2608 }
 0x2e9   :  { %2286 = vmatmul.mubr.msk.f32.vlgmr.msra.gmra.mrb[18].mxu1 %vm317_vm3, %v2609_v30  ;;  %2297 = vmatmul.mubr.msk.f32.vlgmr.msra.gmra.mrb[20].mxu0 %vm317_vm3, %v2609_v30 }
 0x2ea   :  { %2508 = vmatpush3.bf16.msra.mxu1 %v2893_v21  ;;  %2514 = vmatpush3.bf16.msra.mxu0 %v2812_v8 }
 0x2eb   :  { %2509 = vmatprep.subr.bf16.mxu1 %v2710_v7  ;;  %2515 = vmatprep.subr.bf16.mxu0 %v2710_v7 }
 0x2ec   :  { %2307 = vmatprep.mubr.msk.f32.mxu1 %vm2709_vm0, %v2708_v0  ;;  %2318 = vmatprep.mubr.msk.f32.mxu0 %vm2709_vm0, %v2708_v0 }
 0x2ee   :  { %2511 = vmatpush3.bf16.msra.mxu1 %v2896_v23  ;;  %2517 = vmatpush3.bf16.msra.mxu0 %v2829_v12 }
 0x2ef   :  { %2518 = vmatprep.subr.bf16.mxu1 %v2710_v7  ;;  %2524 = vmatprep.subr.bf16.mxu0 %v2710_v7 }
 0x3bc   :  { %v779_v31 = vpop.f32.mrb[18].mxu1  ;;  %v851_v33 = vpop.f32.mrb[20].mxu0 }
 0x3bd   :  { %v780_v34 = vadd.f32 %v2928_v11, %v779_v31  ;;  %v855_v35 = vadd.f32 %v851_v33, %v784_v32  ;;  %v2287_v36 = vpop.f32.mrb[19].mxu1  ;;  %v2298_v37 = vpop.f32.mrb[21].mxu0 }
 0x3bf   :  { %783 = vst.msk [vmem:[#allocation3 + $0x10] sm:$0xff] %vm317_vm3, %v780_v34  ;;  %2610 = vtanh.f32 %v855_v35 }
 0x3c9   :  { %v2611_v38 = vpop.eup %2610 }
 0x3ca   :  { %2308 = vmatmul.mubr.msk.f32.vlgmr.msra.gmra.mrb[20].mxu1 %vm317_vm3, %v2611_v38  ;;  %2319 = vmatmul.mubr.msk.f32.vlgmr.msra.gmra.mrb[22].mxu0 %vm317_vm3, %v2611_v38 }
 0x3cb   :  { %2520 = vmatpush3.bf16.msra.mxu1 %v2893_v21  ;;  %2526 = vmatpush3.bf16.msra.mxu0 %v2812_v8 }
 0x3cc   :  { %2521 = vmatprep.subr.bf16.mxu1 %v2710_v7  ;;  %2527 = vmatprep.subr.bf16.mxu0 %v2710_v7 }
 0x3cd   :  { %2329 = vmatprep.mubr.msk.f32.mxu1 %vm2709_vm0, %v2708_v0  ;;  %2340 = vmatprep.mubr.msk.f32.mxu0 %vm2709_vm0, %v2708_v0 }
 0x3cf   :  { %2523 = vmatpush3.bf16.msra.mxu1 %v2896_v23  ;;  %2529 = vmatpush3.bf16.msra.mxu0 %v2829_v12 }
 0x3d0   :  { %2536 = vmatprep.subr.bf16.mxu0 %v2710_v7  ;;  %2530 = vmatprep.subr.bf16.mxu1 %v2710_v7 }
 0x49d   :  { %v926_v39 = vpop.f32.mrb[20].mxu1  ;;  %v998_v41 = vpop.f32.mrb[22].mxu0 }
 0x49e   :  { %v927_v42 = vadd.f32 %v2928_v11, %v926_v39  ;;  %v1002_v43 = vadd.f32 %v998_v41, %v931_v40  ;;  %v2309_v44 = vpop.f32.mrb[21].mxu1  ;;  %v2320_v45 = vpop.f32.mrb[23].mxu0  ;;  %v1906_v40 = vld [vmem:[#allocation7] sm:$0xff]  ;;  %v1907_v41 = vld [vmem:[#allocation7 + $0x8] sm:$0xff] }
 0x49f   :  { %v1909_v44 = vld [vmem:[#allocation7 + $0x18] sm:$0xff] }
 0x4a0   :  { %930 = vst.msk [vmem:[#allocation3 + $0x18] sm:$0xff] %vm317_vm3, %v927_v42  ;;  %2612 = vtanh.f32 %v1002_v43  ;;  %v1908_v42 = vld [vmem:[#allocation7 + $0x10] sm:$0xff]  ;;  %v2591_v43 = vpack.c.bf16 %v1907_v41, %v1906_v40 }
 0x4a1   :  { %v2594_v45 = vpack.c.bf16 %v1909_v44, %v1908_v42 }
 0x4a7   :  { %v1602_v25 = vld [vmem:[#allocation3 + $0x18] sm:$0xff] }
 0x4aa   :  { %v2613_v46 = vpop.eup %2612 }
 0x4ab   :  { %2330 = vmatmul.mubr.msk.f32.vlgmr.msra.gmra.mrb[22].mxu1 %vm317_vm3, %v2613_v46  ;;  %2341 = vmatmul.mubr.msk.f32.vlgmr.msra.gmra.mrb[24].mxu0 %vm317_vm3, %v2613_v46 }
 0x4ac   :  { %2538 = vmatpush3.bf16.msra.mxu0 %v2812_v8  ;;  %2532 = vmatpush3.bf16.msra.mxu1 %v2893_v21 }
 0x4ad   :  { %2539 = vmatprep.subr.bf16.mxu0 %v2710_v7  ;;  %2533 = vmatprep.subr.bf16.mxu1 %v2710_v7 }
 0x4ae   :  { %2351 = vmatprep.mubr.msk.f32.mxu1 %vm2709_vm0, %v2708_v0  ;;  %2362 = vmatprep.mubr.msk.f32.mxu0 %vm2709_vm0, %v2708_v0 }
 0x4b0   :  { %2541 = vmatpush3.bf16.msra.mxu0 %v2829_v12  ;;  %2535 = vmatpush3.bf16.msra.mxu1 %v2896_v23  ;;  %v2038_v12 = vld [vmem:[%s3097_s5 + $0x20] sm:$0xff] }
 0x4b1   :  { %2548 = vmatprep.subr.bf16.mxu0 %v2710_v7  ;;  %2542 = vmatprep.subr.bf16.mxu1 %v2710_v7  ;;  %v3002_v54 = vpack.c.bf16 %v2039_v53, %v2038_v12 }
 0x57e   :  { %v1073_v8 = vpop.f32.mrb[22].mxu1  ;;  %v1145_v48 = vpop.f32.mrb[24].mxu0 }
 0x57f   :  { %v1074_v49 = vadd.f32 %v2928_v11, %v1073_v8  ;;  %v1149_v50 = vadd.f32 %v1145_v48, %v1078_v47  ;;  %v2331_v51 = vpop.f32.mrb[23].mxu1  ;;  %v2342_v52 = vpop.f32.mrb[25].mxu0 }
 0x581   :  { %1077 = vst.msk [vmem:[#allocation3 + $0x20] sm:$0xff] %vm317_vm3, %v1074_v49  ;;  %2614 = vtanh.f32 %v1149_v50  ;;  %v2048_v49 = vld [vmem:[%s3100_s8] ss:$0 sm:$0xff] }
 0x588   :  { %v1678_v30 = vld [vmem:[#allocation3 + $0x20] sm:$0xff] }
 0x58b   :  { %v2615_v57 = vpop.eup %2614 }
 0x58c   :  { %2352 = vmatmul.mubr.msk.f32.vlgmr.msra.gmra.mrb[24].mxu1 %vm317_vm3, %v2615_v57  ;;  %2363 = vmatmul.mubr.msk.f32.vlgmr.msra.gmra.mrb[26].mxu0 %vm317_vm3, %v2615_v57 }
 0x58d   :  { %2550 = vmatpush3.bf16.msra.mxu0 %v3002_v54  ;;  %2384 = vmatprep.mubr.msk.f32.mxu0 %vm2709_vm0, %v2708_v0 }
 0x58e   :  { %2551 = vmatprep.subr.bf16.mxu0 %v2710_v7  ;;  %2544 = vmatpush3.bf16.msra.mxu1 %v2893_v21 }
 0x58f   :  { %2545 = vmatprep.subr.bf16.mxu1 %v2710_v7  ;;  %2373 = vmatprep.mubr.msk.f32.mxu1 %vm2709_vm0, %v2708_v0 }
 0x591   :  { %2553 = vmatpush3.bf16.msra.mxu0 %v3013_v58 }
 0x592   :  { %2547 = vmatpush3.bf16.msra.mxu1 %v2896_v23  ;;  %2560 = vmatprep.subr.bf16.mxu0 %v2710_v7 }
 0x593   :  { %2554 = vmatprep.subr.bf16.mxu1 %v2710_v7 }
 0x594   :  { %2385 = vmatmul.mubr.f32.vlgmr.msra.gmra.mrb[28].mxu0 %v2708_v0 }
 0x595   :  { %2562 = vmatpush3.bf16.msra.mxu0 %v3002_v54  ;;  %2406 = vmatprep.mubr.msk.f32.mxu0 %vm2709_vm0, %v2708_v0 }
 0x596   :  { %2563 = vmatprep.subr.bf16.mxu0 %v2710_v7 }
 0x599   :  { %2565 = vmatpush3.bf16.msra.mxu0 %v3013_v58 }
 0x59a   :  { %2572 = vmatprep.subr.bf16.mxu0 %v2710_v7 }
 0x65f   :  { %v1220_v21 = vpop.f32.mrb[24].mxu1  ;;  %v1292_v23 = vpop.f32.mrb[26].mxu0 }
 0x660   :  { %v1221_v60 = vadd.f32 %v2928_v11, %v1220_v21  ;;  %v1296_v61 = vadd.f32 %v1292_v23, %v1225_v59  ;;  %v2353_v62 = vpop.f32.mrb[25].mxu1  ;;  %v2364_v63 = vpop.f32.mrb[27].mxu0 }
 0x662   :  { %1224 = vst.msk [vmem:[#allocation3 + $0x28] sm:$0xff] %vm317_vm3, %v1221_v60  ;;  %2616 = vtanh.f32 %v1296_v61 }
 0x667   :  { %v1444_v2 = vpop.f32.mrb[28].mxu0 }
 0x668   :  { %v1448_v3 = vadd.f32 %v1444_v2, %v1377_v1  ;;  %v2386_v4 = vpop.f32.mrb[29].mxu0 }
 0x669   :  { %v1754_v35 = vld [vmem:[#allocation3 + $0x28] sm:$0xff] }
 0x66a   :  { %2618 = vtanh.f32 %v1448_v3 }
 0x66c   :  { %v2617_v5 = vpop.eup %2616 }
 0x66d   :  { %2374 = vmatmul.mubr.msk.f32.vlgmr.msra.gmra.mrb[26].mxu1 %vm317_vm3, %v2617_v5 }
 0x66e   :  { %2556 = vmatpush3.bf16.msra.mxu1 %v3002_v54  ;;  %2395 = vmatprep.mubr.msk.f32.mxu1 %vm2709_vm0, %v2708_v0 }
 0x66f   :  { %2557 = vmatprep.subr.bf16.mxu1 %v2710_v7 }
 0x672   :  { %2559 = vmatpush3.bf16.msra.mxu1 %v3013_v58 }
 0x673   :  { %2566 = vmatprep.subr.bf16.mxu1 %v2710_v7 }
 0x674   :  { %v2619_v6 = vpop.eup %2618 }
 0x675   :  { %2396 = vmatmul.mubr.msk.f32.vlgmr.msra.gmra.mrb[28].mxu1 %vm317_vm3, %v2619_v6 }
 0x676   :  { %2568 = vmatpush3.bf16.msra.mxu1 %v3002_v54  ;;  %2417 = vmatprep.mubr.msk.f32.mxu1 %vm2709_vm0, %v2708_v0 }
 0x677   :  { %2569 = vmatprep.subr.bf16.mxu1 %v2710_v7 }
 0x67a   :  { %2571 = vmatpush3.bf16.msra.mxu1 %v3013_v58 }
 0x67b   :  { %2578 = vmatprep.subr.bf16.mxu1 %v2710_v7 }
 0x740   :  { %v1367_v9 = vpop.f32.mrb[26].mxu1 }
 0x741   :  { %v1368_v10 = vadd.f32 %v2928_v11, %v1367_v9  ;;  %v2375_v13 = vpop.f32.mrb[27].mxu1  ;;  %v1526_v11 = vld [vmem:[#allocation3 + $0x10] sm:$0xff] }
 0x743   :  { %1371 = vst.msk [vmem:[#allocation3 + $0x30] sm:$0xff] %vm317_vm3, %v1368_v10 }
 0x748   :  { %v1520_v15 = vpop.f32.mrb[28].mxu1 }
 0x749   :  { %v1524_v16 = vadd.f32 %v1520_v15, %v1450_v14  ;;  %v2397_v17 = vpop.f32.mrb[29].mxu1 }
 0x74a   :  { %v1830_v46 = vld [vmem:[#allocation3 + $0x30] sm:$0xff] }
 0x74b   :  { %2620 = vtanh.f32 %v1524_v16 }
 0x755   :  { %v2621_v18 = vpop.eup %2620 }
 0x756   :  { %2407 = vmatmul.mubr.msk.f32.vlgmr.msra.gmra.mrb[30].mxu0 %vm317_vm3, %v2621_v18 }
 0x757   :  { %2574 = vmatpush3.bf16.msra.mxu0 %v3002_v54  ;;  %2428 = vmatprep.mubr.msk.f32.mxu0 %vm2709_vm0, %v2708_v0 }
 0x758   :  { %2575 = vmatprep.subr.bf16.mxu0 %v2710_v7 }
 0x75b   :  { %2577 = vmatpush3.bf16.msra.mxu0 %v3013_v58 }
 0x75c   :  { %2584 = vmatprep.subr.bf16.mxu0 %v2710_v7 }
 0x829   :  { %v1596_v19 = vpop.f32.mrb[30].mxu0 }
 0x82a   :  { %v1600_v20 = vadd.f32 %v1596_v19, %v1526_v11  ;;  %v2408_v22 = vpop.f32.mrb[31].mxu0 }
 0x82c   :  { %2622 = vtanh.f32 %v1600_v20 }
 0x836   :  { %v2623_v24 = vpop.eup %2622 }
 0x837   :  { %2418 = vmatmul.mubr.msk.f32.vlgmr.msra.gmra.mrb[30].mxu1 %vm317_vm3, %v2623_v24 }
 0x838   :  { %2580 = vmatpush3.bf16.msra.mxu1 %v3002_v54  ;;  %2439 = vmatprep.mubr.msk.f32.mxu1 %vm2709_vm0, %v2708_v0 }
 0x839   :  { %2581 = vmatprep.subr.bf16.mxu1 %v2710_v7 }
 0x83c   :  { %2583 = vmatpush3.bf16.msra.mxu1 %v3013_v58 }
 0x83d   :  { %2590 = vmatprep.subr.bf16.mxu1 %v2710_v7 }
 0x90a   :  { %v1672_v26 = vpop.f32.mrb[30].mxu1 }
 0x90b   :  { %v1676_v27 = vadd.f32 %v1672_v26, %v1602_v25  ;;  %v2419_v28 = vpop.f32.mrb[31].mxu1 }
 0x90d   :  { %2624 = vtanh.f32 %v1676_v27 }
 0x917   :  { %v2625_v29 = vpop.eup %2624 }
 0x918   :  { %2429 = vmatmul.mubr.msk.f32.vlgmr.msra.gmra.mrb[32].mxu0 %vm317_vm3, %v2625_v29 }
 0x919   :  { %2586 = vmatpush3.bf16.msra.mxu0 %v3002_v54  ;;  %2450 = vmatprep.mubr.msk.f32.mxu0 %vm2709_vm0, %v2708_v0 }
 0x91a   :  { %2587 = vmatprep.subr.bf16.mxu0 %v2710_v7 }
 0x91d   :  { %2589 = vmatpush3.bf16.msra.mxu0 %v3013_v58 }
 0x9eb   :  { %v1748_v31 = vpop.f32.mrb[32].mxu0 }
 0x9ec   :  { %v1752_v32 = vadd.f32 %v1748_v31, %v1678_v30  ;;  %v2430_v33 = vpop.f32.mrb[33].mxu0 }
 0x9ee   :  { %2626 = vtanh.f32 %v1752_v32 }
 0x9f8   :  { %v2627_v34 = vpop.eup %2626 }
 0x9f9   :  { %2440 = vmatmul.mubr.msk.f32.vlgmr.msra.gmra.mrb[32].mxu1 %vm317_vm3, %v2627_v34 }
 0x9fa   :  { %2461 = vmatprep.mubr.msk.f32.mxu1 %vm2709_vm0, %v2708_v0  ;;  %2592 = vmatpush3.bf16.msra.mxu1 %v2591_v43 }
 0x9fb   :  { %2593 = vmatprep.subr.bf16.mxu1 %v2710_v7 }
 0x9fe   :  { %2595 = vmatpush3.bf16.msra.mxu1 %v2594_v45 }
 0xacc   :  { %v1824_v36 = vpop.f32.mrb[32].mxu1 }
 0xacd   :  { %v1828_v37 = vadd.f32 %v1824_v36, %v1754_v35  ;;  %v2441_v38 = vpop.f32.mrb[33].mxu1 }
 0xacf   :  { %2628 = vtanh.f32 %v1828_v37 }
 0xad9   :  { %v2629_v39 = vpop.eup %2628 }
 0xada   :  { %2451 = vmatmul.mubr.msk.f32.vlgmr.msra.gmra.mrb[34].mxu0 %vm317_vm3, %v2629_v39 }
 0xbad   :  { %v1900_v0 = vpop.f32.mrb[34].mxu0 }
 0xbae   :  { %v1904_v8 = vadd.f32 %v1900_v0, %v1830_v46  ;;  %v2452_v47 = vpop.f32.mrb[35].mxu0 }
 0xbb0   :  { %2630 = vtanh.f32 %v1904_v8 }
 0xbba   :  { %v2631_v48 = vpop.eup %2630 }
 0xbbb   :  { %2462 = vmatmul.mubr.msk.f32.vlgmr.msra.gmra.mrb[34].mxu1 %vm317_vm3, %v2631_v48 }
 0xc8e   :  { %v1986_v50 = vpop.f32.mrb[34].mxu1 }
 0xc8f   :  { %v1987_v51 = vadd.f32 %v2048_v49, %v1986_v50  ;;  %v2463_v52 = vpop.f32.mrb[35].mxu1 }
 0xc91   :  { %1990 = vst [vmem:[#allocation9] sm:$0xff] %v1987_v51 }
 0xc92   :  { %2687 = shalt.err (!%p2684_p6)
}
 0xc93   :  { %s2688_s28 = scalar_lea.hbm %s3101_s9, 128 }
 0xc94   :  { %p2689_p7 = scmp.ne.s32.totalorder %s3101_s9, %s2688_s28  ;;  %p2692_p8 = scmp.lt.u32.totalorder %s2688_s28, %s3101_s9 }
 0xc96   :  { %p2694_p9 = pnand %p2692_p8, %p2689_p7 }
 0xc98   :  { %2697 = shalt.err (!%p2694_p9)
}
 0xc99   :  { %2000 = dma.vmem_to_hbm [thread:$0]  %s1998_s24, 128, %s3101_s9, [#allocation6]  }
 0xc9a   :  { %2702 = dma.done.wait [#allocation6], 128  }
 0xc9b   :  { %2703 = vsyncadd [#allocation6], 4294967168 }
 0xc9c   :  { %2004 = vsyncpa [#allocation5], 1 }
 0xc9d   :  { %2005 = vsyncpa [#allocation8], 1 }
 0xc9e   :  { %2006 = vsyncpa [#allocation6], 1 }

</bundles_post_ra>
